<compile_context>
chip_gen: v6e
topology: v6e:2x2x1
jax: 0.10.0
libtpu: 0.0.40
codegen_flags: <defaults>
</compile_context>

<pallas_src>
import jax
import jax.numpy as jnp
from jax.experimental import pallas as pl
from jax.experimental.pallas import tpu as pltpu

NEG_SLOPE = 0.01  # torch.nn.LeakyReLU default
D_IN, D_H1, D_H2, D_OUT = 7, 32, 64, 128
TB_MAX = 1024  # batch tile: ~85% of HBM roofline; well inside VMEM on v5e/v6e/v7x


def _leaky_relu(x):
    return jnp.where(x >= 0, x, NEG_SLOPE * x)


def pose_to_feature_kernel(x_ref, w1_ref, b1_ref, w2_ref, b2_ref,
                           w3_ref, b3_ref, o_ref):
    # x_ref: (TB, 7); w{i}_ref: (in_i, out_i); b{i}_ref: (1, out_i); o_ref: (TB, 128)
    x = x_ref[...]

    h1 = jnp.dot(x, w1_ref[...], preferred_element_type=jnp.float32) + b1_ref[...]
    h1 = _leaky_relu(h1)

    h2 = jnp.dot(h1, w2_ref[...], preferred_element_type=jnp.float32) + b2_ref[...]
    h2 = _leaky_relu(h2)

    h3 = jnp.dot(h2, w3_ref[...], preferred_element_type=jnp.float32) + b3_ref[...]
    h3 = _leaky_relu(h3)

    o_ref[...] = h3.astype(o_ref.dtype)


def pose_to_feature(x, params, *, out_dtype=jnp.float32):
    """x: any shape (B, ...) flattening to (B, 7). Returns (B, 128)."""
    B = x.shape[0]
    x2d = x.reshape(B, -1).astype(jnp.float32)          # x.view(B, -1)
    assert x2d.shape[1] == D_IN, f"expected flattened dim {D_IN}, got {x2d.shape[1]}"

    (w1, b1), (w2, b2), (w3, b3) = params

    # Pad batch to a multiple of 8 (sublane granularity) so the batch tile is legal.
    B_pad = -(-B // 8) * 8
    if B_pad != B:
        x2d = jnp.pad(x2d, ((0, B_pad - B), (0, 0)))

    TB = min(TB_MAX, B_pad)                              # always a multiple of 8
    grid = (pl.cdiv(B_pad, TB),)

    x_spec = pl.BlockSpec((TB, D_IN), lambda i: (i, 0))
    o_spec = pl.BlockSpec((TB, D_OUT), lambda i: (i, 0))
    # Constant block index -> Pallas keeps weights/biases resident, no re-DMA.
    const = lambda shape: pl.BlockSpec(shape, lambda i, _n=len(shape): (0,) * _n)

    flops = 2 * B_pad * (D_IN * D_H1 + D_H1 * D_H2 + D_H2 * D_OUT)
    w_bytes = sum(int(a.size) * a.dtype.itemsize for pair in params for a in pair)
    bytes_accessed = B_pad * (D_IN * 4 + D_OUT * jnp.dtype(out_dtype).itemsize) + w_bytes

    out = pl.pallas_call(
        pose_to_feature_kernel,
        out_shape=jax.ShapeDtypeStruct((B_pad, D_OUT), out_dtype),
        grid=grid,
        in_specs=[
            x_spec,
            const(w1.shape), const(b1.shape),
            const(w2.shape), const(b2.shape),
            const(w3.shape), const(b3.shape),
        ],
        out_specs=o_spec,
        compiler_params=pltpu.CompilerParams(
            # Batch axis is independent -> shard across both TCs on v7x.
            dimension_semantics=("parallel",),
        ),
        cost_estimate=pl.CostEstimate(
            flops=flops, transcendentals=0, bytes_accessed=bytes_accessed),
    )(x2d, w1, b1, w2, b2, w3, b3)

    if B_pad != B:
        out = out[:B]
    return out


def init_params(key):
    """Deterministic init mimicking nn.Linear default (uniform ±1/sqrt(fan_in)).

    Weights are stored pre-transposed as (in_dim, out_dim) so the kernel does
    x @ W (equivalent to torch's x @ weight.T).
    """
    dims = [(D_IN, D_H1), (D_H1, D_H2), (D_H2, D_OUT)]
    params = []
    for i, (din, dout) in enumerate(dims):
        kw, kb = jax.random.split(jax.random.fold_in(key, i))
        bound = 1.0 / (din ** 0.5)
        w = jax.random.uniform(kw, (din, dout), jnp.float32, -bound, bound)
        b = jax.random.uniform(kb, (1, dout), jnp.float32, -bound, bound)
        params.append((w, b))
    return params


def pose_to_feature_ref(x, params):
    """Pure-JAX reference for correctness check."""
    h = x.reshape(x.shape[0], -1).astype(jnp.float32)
    for w, b in params:
        h = h @ w + b
        h = jnp.where(h >= 0, h, NEG_SLOPE * h)
    return h


if __name__ == "__main__":
    key = jax.random.PRNGKey(0)
    kx, kp, kx2 = jax.random.split(key, 3)

    params = init_params(kp)

    # pose input: batch=8, one 7-dof pose each (quaternion + translation)
    x = jax.random.normal(kx, (8, 1, 7), jnp.float32)
    out = jax.block_until_ready(pose_to_feature(x, params))
    ref = pose_to_feature_ref(x, params)
    assert out.shape == (8, 128), out.shape
    assert jnp.allclose(out, ref, atol=1e-5, rtol=1e-5), "mismatch vs reference"

    # batch not a multiple of the sublane width -> exercises the padded path
    x2 = jax.random.normal(kx2, (10, 7), jnp.float32)
    out2 = jax.block_until_ready(pose_to_feature(x2, params))
    ref2 = pose_to_feature_ref(x2, params)
    assert out2.shape == (10, 128), out2.shape
    assert jnp.allclose(out2, ref2, atol=1e-5, rtol=1e-5), "mismatch vs reference (padded)"

    print("KERNEL_OK")
</pallas_src>

<mosaic_0001>
module attributes {stable_mosaic.version = 11 : i64} {
  func.func @pose_to_feature_kernel(%arg0: i32, %arg1: memref<8x7xf32, #tpu.memory_space<vmem>>, %arg2: memref<7x32xf32, #tpu.memory_space<vmem>>, %arg3: memref<1x32xf32, #tpu.memory_space<vmem>>, %arg4: memref<32x64xf32, #tpu.memory_space<vmem>>, %arg5: memref<1x64xf32, #tpu.memory_space<vmem>>, %arg6: memref<64x128xf32, #tpu.memory_space<vmem>>, %arg7: memref<1x128xf32, #tpu.memory_space<vmem>>, %arg8: memref<8x128xf32, #tpu.memory_space<vmem>>) attributes {dimension_semantics = [#tpu.dimension_semantics<parallel>], iteration_bounds = array<i64: 1>, scalar_prefetch = 0 : i64, scratch_operands = 0 : i64, tpu.core_type = #tpu.core_type<tc>, window_params = [{transform_indices = @transform_0, window_bounds = array<i64: 8, 7>}, {pipeline_mode = #tpu.pipeline_mode<synchronous>, transform_indices = @transform_1, window_bounds = array<i64: 7, 32>}, {pipeline_mode = #tpu.pipeline_mode<synchronous>, transform_indices = @transform_2, window_bounds = array<i64: 1, 32>}, {pipeline_mode = #tpu.pipeline_mode<synchronous>, transform_indices = @transform_3, window_bounds = array<i64: 32, 64>}, {pipeline_mode = #tpu.pipeline_mode<synchronous>, transform_indices = @transform_4, window_bounds = array<i64: 1, 64>}, {pipeline_mode = #tpu.pipeline_mode<synchronous>, transform_indices = @transform_5, window_bounds = array<i64: 64, 128>}, {pipeline_mode = #tpu.pipeline_mode<synchronous>, transform_indices = @transform_6, window_bounds = array<i64: 1, 128>}, {transform_indices = @transform_7, window_bounds = array<i64: 8, 128>}]} {
    %c0 = arith.constant 0 : index
    %c0_0 = arith.constant 0 : index
    %0 = vector.load %arg1[%c0, %c0_0] : memref<8x7xf32, #tpu.memory_space<vmem>>, vector<8x7xf32>
    %c0_1 = arith.constant 0 : index
    %c0_2 = arith.constant 0 : index
    %1 = vector.load %arg2[%c0_1, %c0_2] : memref<7x32xf32, #tpu.memory_space<vmem>>, vector<7x32xf32>
    %cst = arith.constant dense<0.000000e+00> : vector<8x32xf32>
    %2 = tpu.matmul %0, %1, %cst {dimension_numbers = #tpu.dot_dimension_numbers<[1], [0], [0], [1], [0, 0, 1, 1], [], []>} : vector<8x7xf32>, vector<7x32xf32>, vector<8x32xf32> -> vector<8x32xf32>
    %c0_3 = arith.constant 0 : index
    %c0_4 = arith.constant 0 : index
    %3 = vector.load %arg3[%c0_3, %c0_4] : memref<1x32xf32, #tpu.memory_space<vmem>>, vector<1x32xf32>
    %4 = vector.broadcast %3 : vector<1x32xf32> to vector<8x32xf32>
    %5 = arith.addf %2, %4 : vector<8x32xf32>
    %cst_5 = arith.constant 0.000000e+00 : f32
    %6 = vector.broadcast %cst_5 : f32 to vector<8x32xf32>
    %7 = arith.cmpf oge, %5, %6 : vector<8x32xf32>
    %cst_6 = arith.constant 0.00999999977 : f32
    %8 = vector.broadcast %cst_6 : f32 to vector<8x32xf32>
    %9 = arith.mulf %8, %5 : vector<8x32xf32>
    %10 = arith.select %7, %5, %9 : vector<8x32xi1>, vector<8x32xf32>
    %c0_7 = arith.constant 0 : index
    %c0_8 = arith.constant 0 : index
    %11 = vector.load %arg4[%c0_7, %c0_8] : memref<32x64xf32, #tpu.memory_space<vmem>>, vector<32x64xf32>
    %cst_9 = arith.constant dense<0.000000e+00> : vector<8x64xf32>
    %12 = tpu.matmul %10, %11, %cst_9 {dimension_numbers = #tpu.dot_dimension_numbers<[1], [0], [0], [1], [0, 0, 1, 1], [], []>} : vector<8x32xf32>, vector<32x64xf32>, vector<8x64xf32> -> vector<8x64xf32>
    %c0_10 = arith.constant 0 : index
    %c0_11 = arith.constant 0 : index
    %13 = vector.load %arg5[%c0_10, %c0_11] : memref<1x64xf32, #tpu.memory_space<vmem>>, vector<1x64xf32>
    %14 = vector.broadcast %13 : vector<1x64xf32> to vector<8x64xf32>
    %15 = arith.addf %12, %14 : vector<8x64xf32>
    %cst_12 = arith.constant 0.000000e+00 : f32
    %16 = vector.broadcast %cst_12 : f32 to vector<8x64xf32>
    %17 = arith.cmpf oge, %15, %16 : vector<8x64xf32>
    %cst_13 = arith.constant 0.00999999977 : f32
    %18 = vector.broadcast %cst_13 : f32 to vector<8x64xf32>
    %19 = arith.mulf %18, %15 : vector<8x64xf32>
    %20 = arith.select %17, %15, %19 : vector<8x64xi1>, vector<8x64xf32>
    %c0_14 = arith.constant 0 : index
    %c0_15 = arith.constant 0 : index
    %21 = vector.load %arg6[%c0_14, %c0_15] : memref<64x128xf32, #tpu.memory_space<vmem>>, vector<64x128xf32>
    %cst_16 = arith.constant dense<0.000000e+00> : vector<8x128xf32>
    %22 = tpu.matmul %20, %21, %cst_16 {dimension_numbers = #tpu.dot_dimension_numbers<[1], [0], [0], [1], [0, 0, 1, 1], [], []>} : vector<8x64xf32>, vector<64x128xf32>, vector<8x128xf32> -> vector<8x128xf32>
    %c0_17 = arith.constant 0 : index
    %c0_18 = arith.constant 0 : index
    %23 = vector.load %arg7[%c0_17, %c0_18] : memref<1x128xf32, #tpu.memory_space<vmem>>, vector<1x128xf32>
    %24 = vector.broadcast %23 : vector<1x128xf32> to vector<8x128xf32>
    %25 = arith.addf %22, %24 : vector<8x128xf32>
    %cst_19 = arith.constant 0.000000e+00 : f32
    %26 = vector.broadcast %cst_19 : f32 to vector<8x128xf32>
    %27 = arith.cmpf oge, %25, %26 : vector<8x128xf32>
    %cst_20 = arith.constant 0.00999999977 : f32
    %28 = vector.broadcast %cst_20 : f32 to vector<8x128xf32>
    %29 = arith.mulf %28, %25 : vector<8x128xf32>
    %30 = arith.select %27, %25, %29 : vector<8x128xi1>, vector<8x128xf32>
    %c0_21 = arith.constant 0 : index
    %c0_22 = arith.constant 0 : index
    %31 = vector.load %arg8[%c0_21, %c0_22] : memref<8x128xf32, #tpu.memory_space<vmem>>, vector<8x128xf32>
    tpu.vector_store %arg8[%c0_21, %c0_22], %30 {strides = array<i32>} : memref<8x128xf32, #tpu.memory_space<vmem>>, vector<8x128xf32>,
    return
  }
  func.func @transform_0(%arg0: i32) -> (i32, i32) {
    %c0_i32 = arith.constant 0 : i32
    %c0_i32_0 = arith.constant 0 : i32
    return %arg0, %c0_i32 : i32, i32
  }
  func.func @transform_1(%arg0: i32) -> (i32, i32) {
    %c0_i32 = arith.constant 0 : i32
    %c0_i32_0 = arith.constant 0 : i32
    %c0_i32_1 = arith.constant 0 : i32
    return %c0_i32, %c0_i32_0 : i32, i32
  }
  func.func @transform_2(%arg0: i32) -> (i32, i32) {
    %c0_i32 = arith.constant 0 : i32
    %c0_i32_0 = arith.constant 0 : i32
    %c0_i32_1 = arith.constant 0 : i32
    return %c0_i32, %c0_i32_0 : i32, i32
  }
  func.func @transform_3(%arg0: i32) -> (i32, i32) {
    %c0_i32 = arith.constant 0 : i32
    %c0_i32_0 = arith.constant 0 : i32
    %c0_i32_1 = arith.constant 0 : i32
    return %c0_i32, %c0_i32_0 : i32, i32
  }
  func.func @transform_4(%arg0: i32) -> (i32, i32) {
    %c0_i32 = arith.constant 0 : i32
    %c0_i32_0 = arith.constant 0 : i32
    %c0_i32_1 = arith.constant 0 : i32
    return %c0_i32, %c0_i32_0 : i32, i32
  }
  func.func @transform_5(%arg0: i32) -> (i32, i32) {
    %c0_i32 = arith.constant 0 : i32
    %c0_i32_0 = arith.constant 0 : i32
    %c0_i32_1 = arith.constant 0 : i32
    return %c0_i32, %c0_i32_0 : i32, i32
  }
  func.func @transform_6(%arg0: i32) -> (i32, i32) {
    %c0_i32 = arith.constant 0 : i32
    %c0_i32_0 = arith.constant 0 : i32
    %c0_i32_1 = arith.constant 0 : i32
    return %c0_i32, %c0_i32_0 : i32, i32
  }
  func.func @transform_7(%arg0: i32) -> (i32, i32) {
    %c0_i32 = arith.constant 0 : i32
    %c0_i32_0 = arith.constant 0 : i32
    return %arg0, %c0_i32 : i32, i32
  }
}

</mosaic_0001>

<bundles_post_ra>
// kernel: tpu_custom_call.1
= control target key start
LH: loop header
LB: loop body
LE: loop exit
PB: predicated region body
PF: predicated region fallthrough
CT: control target
= control target key end

     0   :  { %12 = vsyncpa [#allocation3], 0  ;;  %s614_s0 = inlined_call_operand.hbm [shape: f32[8,7], index: 0, kind: input, shape index: {}]   ;;  %s615_s1 = inlined_call_operand.hbm [shape: f32[7,32], index: 1, kind: input, shape index: {}]   ;;  %s616_s2 = inlined_call_operand.vmem [shape: f32[1,32], index: 2, kind: input, shape index: {}]   ;;  %s617_s3 = inlined_call_operand.hbm [shape: f32[32,64], index: 3, kind: input, shape index: {}]   ;;  %s618_s4 = inlined_call_operand.vmem [shape: f32[1,64], index: 4, kind: input, shape index: {}]   ;;  %s619_s5 = inlined_call_operand.hbm [shape: f32[64,128], index: 5, kind: input, shape index: {}]   ;;  %s620_s6 = inlined_call_operand.vmem [shape: f32[1,128], index: 6, kind: input, shape index: {}]   ;;  %s621_s7 = inlined_call_operand.hbm [shape: f32[8,128], index: 7, kind: output, shape index: {}]  }
   0x1   :  { %13 = vsyncpa [#allocation6], 0 }
   0x2   :  { %14 = vsyncpa [#allocation9], 0 }
   0x3   :  { %15 = vsyncpa [#allocation4], 0  ;;  %s541_s24 = smov [#allocation5]   ;;  %s542_s26 = smov [#allocation2]  }
   0x4   :  { %s32_s25 = sshll.u32 %s541_s24, 4  ;;  %s22_s27 = sshll.u32 %s542_s26, 4  ;;  %s33_s25 = int_to_ptr.vmem [resolvable:$true] %s32_s25  ;;  %s23_s27 = int_to_ptr.vmem [resolvable:$true] %s22_s27 }
   0x5   :  { %s441_s28 = scalar_lea.vmem %s33_s25, 128  ;;  %p446_p1 = scmp.lt.s32.totalorder %s33_s25, %s33_s25 }
   0x6   :  { %p442_p0 = scmp.ne.s32.totalorder %s33_s25, %s441_s28  ;;  %p447_p2 = scmp.lt.s32.totalorder %s441_s28, %s441_s28 }
   0x8   :  { %p448_p3 = por %p447_p2, %p446_p1 }
   0xa   :  { %p449_p4 = pnand %p448_p3, %p442_p0 }
   0xc   :  { %452 = shalt.err (!%p449_p4)
}
   0xd   :  { %35 = dma.hbm_to_vmem [thread:$0]  %s615_s1, 128, %s33_s25, [#allocation6]  }
   0xe   :  { %s461_s8 = scalar_lea.vmem %s23_s27, 128  ;;  %p466_p6 = scmp.lt.s32.totalorder %s23_s27, %s23_s27 }
   0xf   :  { %p462_p5 = scmp.ne.s32.totalorder %s23_s27, %s461_s8  ;;  %p467_p7 = scmp.lt.s32.totalorder %s461_s8, %s461_s8 }
  0x11   :  { %p468_p8 = por %p467_p7, %p466_p6 }
  0x13   :  { %p469_p9 = pnand %p468_p8, %p462_p5 }
  0x15   :  { %472 = shalt.err (!%p469_p9)
}
  0x16   :  { %25 = dma.hbm_to_vmem [thread:$0]  %s614_s0, 128, %s23_s27, [#allocation3]  }
  0x17   :  { %s543_s11 = smov [#allocation7]  }
  0x18   :  { %s43_s12 = sshll.u32 %s543_s11, 4  ;;  %s44_s12 = int_to_ptr.vmem [resolvable:$true] %s43_s12 }
  0x19   :  { %s481_s13 = scalar_lea.vmem %s44_s12, 512  ;;  %p486_p11 = scmp.lt.s32.totalorder %s44_s12, %s44_s12 }
  0x1a   :  { %p482_p10 = scmp.ne.s32.totalorder %s44_s12, %s481_s13  ;;  %p487_p12 = scmp.lt.s32.totalorder %s481_s13, %s481_s13 }
  0x1c   :  { %p488_p13 = por %p487_p12, %p486_p11 }
  0x1e   :  { %p489_p0 = pnand %p488_p13, %p482_p10 }
  0x20   :  { %492 = shalt.err (!%p489_p0)
}
  0x21   :  { %s544_s1 = smov 128   ;;  %s545_s14 = smov 8  }
  0x22   :  { %49 = dma.hbm_to_vmem [thread:$0]  %s617_s3, 512, %s44_s12, [#allocation6], %s544_s1, %s544_s1, %s545_s14  }
  0x23   :  { %s546_s17 = smov [#allocation8]  }
  0x24   :  { %s57_s18 = sshll.u32 %s546_s17, 4  ;;  %s58_s18 = int_to_ptr.vmem [resolvable:$true] %s57_s18 }
  0x25   :  { %s501_s0 = scalar_lea.vmem %s58_s18, 1024  ;;  %p506_p2 = scmp.lt.s32.totalorder %s58_s18, %s58_s18 }
  0x26   :  { %p502_p1 = scmp.ne.s32.totalorder %s58_s18, %s501_s0  ;;  %p507_p3 = scmp.lt.s32.totalorder %s501_s0, %s501_s0 }
  0x28   :  { %p508_p4 = por %p507_p3, %p506_p2 }
  0x2a   :  { %p509_p5 = pnand %p508_p4, %p502_p1 }
  0x2c   :  { %512 = shalt.err (!%p509_p5)
}
  0x2d   :  { %63 = dma.hbm_to_vmem [thread:$0]  %s619_s5, 1024, %s58_s18, [#allocation9], %s544_s1, %s544_s1, %s545_s14  }
  0x2e   :  { %533 = dma.done.wait [#allocation3], 128  }
  0x2f   :  { %534 = vsyncadd [#allocation3], 4294967168 }
  0x30   :  { %535 = dma.done.wait [#allocation6], 640  }
  0x31   :  { %536 = vsyncadd [#allocation6], 4294966656 }
  0x32   :  { %537 = dma.done.wait [#allocation9], 1024  }
  0x33   :  { %538 = vsyncadd [#allocation9], 4294966272  ;;  %v547_v0 = vmov 0.0   ;;  %vm548_vm0 = vmmov 0   ;;  %vm91_vm1 = vcmask 1046528   ;;  %vm87_vm2 = vcmask 56320  }
  0x34   :  { %389 = vmatprep.subr.mxu1 %v547_v0  ;;  %391 = vmatprep.mubr.msk.f32.mxu1 %vm548_vm0, %v547_v0  ;;  %v79_v1 = vld [vmem:[#allocation5] sm:$0x7f]  ;;  %v78_v2 = vld [vmem:[#allocation2] sm:$0xff]  ;;  %v169_v5 = vld [vmem:[#allocation7 + $0x8] sm:$0xff]  ;;  %vm179_vm4 = vcmask 261120   ;;  %vm271_vm6 = vcmask 523264  }
  0x35   :  { %405 = vmatprep.subr.mxu0 %v547_v0  ;;  %421 = vmatprep.mubr.msk.f32.mxu0 %vm548_vm0, %v547_v0  ;;  %v171_v3 = vld [vmem:[#allocation7 + $0x18] sm:$0xff]  ;;  %v170_v4 = vld [vmem:[#allocation7 + $0x10] sm:$0xff]  ;;  %v168_v6 = vld [vmem:[#allocation7] sm:$0xff]  ;;  %s549_s24 = smov [#allocation10]  }
  0x36   :  { %390 = vmatpush3.msk.msra.mxu1 %vm91_vm1, %v79_v1  ;;  %v263_v7 = vld [vmem:[#allocation8 + $0x38] sm:$0xff]  ;;  %v262_v8 = vld [vmem:[#allocation8 + $0x30] sm:$0xff]  ;;  %v261_v9 = vld [vmem:[#allocation8 + $0x28] sm:$0xff]  ;;  %s355_s25 = sshll.u32 %s549_s24, 4  ;;  %s356_s25 = int_to_ptr.vmem [resolvable:$true] %s355_s25 }
  0x37   :  { %392 = vmatmul.mubr.msk.f32.vlgmr.msra.gmra.mxu1 %vm87_vm2, %v78_v2  ;;  %394 = vmatprep.subr.mxu1 %v547_v0  ;;  %v260_v10 = vld [vmem:[#allocation8 + $0x20] sm:$0xff]  ;;  %v259_v11 = vld [vmem:[#allocation8 + $0x18] sm:$0xff]  ;;  %v366_v12 = vld [vmem:[%s616_s2] ss:$0 sm:$0xff]  ;;  %p518_p7 = scmp.lt.s32.totalorder %s356_s25, %s356_s25 }
  0x38   :  { %395 = vmatpush3.msra.mxu1 %v171_v3  ;;  %402 = vmatprep.mubr.msk.f32.mxu1 %vm548_vm0, %v547_v0  ;;  %v258_v18 = vld [vmem:[#allocation8 + $0x10] sm:$0xff]  ;;  %v257_v19 = vld [vmem:[#allocation8 + $0x8] sm:$0xff]  ;;  %v256_v20 = vld [vmem:[#allocation8] sm:$0xff] }
  0x39   :  { %396 = vmatprep.subr.mxu1 %v547_v0  ;;  %406 = vmatpush3.msra.mxu0 %v263_v7  ;;  %v369_v21 = vld [vmem:[%s618_s4] ss:$0 sm:$0xff]  ;;  %s513_s4 = scalar_lea.vmem %s356_s25, 128 }
  0x3a   :  { %397 = vmatpush3.msra.mxu1 %v170_v4  ;;  %407 = vmatprep.subr.mxu0 %v547_v0  ;;  %v371_v27 = vld [vmem:[%s620_s6] ss:$0 sm:$0xff]  ;;  %p514_p6 = scmp.ne.s32.totalorder %s356_s25, %s513_s4  ;;  %p519_p8 = scmp.lt.s32.totalorder %s513_s4, %s513_s4 }
  0x3b   :  { %398 = vmatprep.subr.mxu1 %v547_v0  ;;  %408 = vmatpush3.msra.mxu0 %v262_v8 }
  0x3c   :  { %399 = vmatpush3.msra.mxu1 %v169_v5  ;;  %409 = vmatprep.subr.mxu0 %v547_v0  ;;  %p520_p9 = por %p519_p8, %p518_p7 }
  0x3d   :  { %400 = vmatprep.subr.mxu1 %v547_v0  ;;  %410 = vmatpush3.msra.mxu0 %v261_v9 }
  0x3e   :  { %401 = vmatpush3.msra.mxu1 %v168_v6  ;;  %411 = vmatprep.subr.mxu0 %v547_v0  ;;  %p521_p10 = pnand %p520_p9, %p514_p6 }
  0x3f   :  { %412 = vmatpush3.msra.mxu0 %v260_v10 }
  0x40   :  { %413 = vmatprep.subr.mxu0 %v547_v0 }
  0x41   :  { %414 = vmatpush3.msra.mxu0 %v259_v11 }
  0x42   :  { %415 = vmatprep.subr.mxu0 %v547_v0 }
  0x43   :  { %416 = vmatpush3.msra.mxu0 %v258_v18 }
  0x44   :  { %417 = vmatprep.subr.mxu0 %v547_v0 }
  0x45   :  { %418 = vmatpush3.msra.mxu0 %v257_v19 }
  0x46   :  { %419 = vmatprep.subr.mxu0 %v547_v0 }
  0x47   :  { %420 = vmatpush3.msra.mxu0 %v256_v20 }
  0xf7   :  { %v161_v13 = vpop.f32.mrf.mxu1 }
  0xf8   :  { %v162_v14 = vadd.f32 %v366_v12, %v161_v13 }
  0xf9   :  { %v393_v15 = vpop.f32.mrf.mxu1 }
  0xfa   :  { %vm165_vm3 = vcmp.ge.f32.partialorder %v162_v14, 0.0  ;;  %v166_v16 = vmul.f32 0.01, %v162_v14 }
  0xfc   :  { %v167_v17 = vsel %vm165_vm3, %v162_v14, %v166_v16 }
  0xfd   :  { %403 = vmatmul.mubr.msk.f32.vlgmr.msra.gmra.mxu1 %vm179_vm4, %v167_v17 }
 0x1bd   :  { %v249_v22 = vpop.f32.mrf.mxu1 }
 0x1be   :  { %v250_v23 = vadd.f32 %v369_v21, %v249_v22 }
 0x1bf   :  { %v404_v24 = vpop.f32.mrf.mxu1 }
 0x1c0   :  { %vm253_vm5 = vcmp.ge.f32.partialorder %v250_v23, 0.0  ;;  %v254_v25 = vmul.f32 0.01, %v250_v23 }
 0x1c2   :  { %v255_v26 = vsel %vm253_vm5, %v250_v23, %v254_v25 }
 0x1c3   :  { %422 = vmatmul.mubr.msk.f32.vlgmr.msra.gmra.mxu0 %vm271_vm6, %v255_v26 }
 0x283   :  { %v341_v28 = vpop.f32.mrf.mxu0 }
 0x284   :  { %v342_v29 = vadd.f32 %v371_v27, %v341_v28 }
 0x285   :  { %v423_v30 = vpop.f32.mrf.mxu0 }
 0x286   :  { %v346_v31 = vmul.f32 0.01, %v342_v29  ;;  %vm345_vm7 = vcmp.ge.f32.partialorder %v342_v29, 0.0 }
 0x288   :  { %v347_v32 = vsel %vm345_vm7, %v342_v29, %v346_v31 }
 0x289   :  { %348 = vst [vmem:[#allocation10] sm:$0xff] %v347_v32 }
 0x28a   :  { %524 = shalt.err (!%p521_p10)
}
 0x28b   :  { %358 = dma.vmem_to_hbm [thread:$0]  %s356_s25, 128, %s621_s7, [#allocation4]  }
 0x28c   :  { %539 = dma.done.wait [#allocation4], 128  }
 0x28d   :  { %540 = vsyncadd [#allocation4], 4294967168 }
 0x28e   :  { %362 = vsyncpa [#allocation3], 1 }
 0x28f   :  { %363 = vsyncpa [#allocation6], 1 }
 0x290   :  { %364 = vsyncpa [#allocation9], 1 }
 0x291   :  { %365 = vsyncpa [#allocation4], 1 }

</bundles_post_ra>
